<compile_context>
chip_gen: v7x
topology: tpu7x:2x2x1
jax: 0.10.0
libtpu: 0.0.40
codegen_flags: <defaults>
</compile_context>

<pallas_src>
import functools

import jax
import jax.numpy as jnp
from jax.experimental import pallas as pl
from jax.experimental.pallas import tpu as pltpu


# ---------------------------------------------------------------------------
# Kernel
# ---------------------------------------------------------------------------
def _global_attention_kernel(ctx_ref, bias_ref, q_ref, wm_ref, wq_ref, b_ref,
                             vw_ref, c_ref, sc_ref, *, s_chunk):
    TB, S, C = ctx_ref.shape          # block_b batch elements per grid step
    A = wm_ref.shape[1]
    Q = q_ref.shape[-1]

    # keys = memory_layer(context): one merged (TB*S, C) @ (C, A) MXU matmul so
    # the MXU M dimension is filled. The reshape is free when S is a multiple
    # of the sublane pack (8 f32 / 16 bf16); otherwise a small relayout
    # (perf-only).  TODO(synk): pre-flatten context to (B*S, C) in the wrapper
    # for unaligned-S bf16 inputs.
    ctx2d = ctx_ref[...].reshape(TB * S, C)
    keys = jnp.dot(ctx2d, wm_ref[...], preferred_element_type=jnp.float32)
    keys = keys.reshape(TB, S, A)                                # (TB, S, A) f32

    # processed_q = query_layer(query) + (bm + bq)  (biases folded in wrapper).
    q = q_ref[...].reshape(TB, Q)
    pq = jnp.dot(q, wq_ref[...],
                 preferred_element_type=jnp.float32) + b_ref[...]   # (TB, A)

    # scores = v(tanh(keys + pq)): output width is 1, so use a VPU multiply +
    # lane (XLU) reduce instead of a degenerate N=1 MXU dot. v's bias is a
    # constant shift of every unmasked score -> softmax no-op -> dropped.
    e = jnp.tanh(keys + pq[:, None, :])                          # (TB, S, A) f32
    s = jnp.sum(e * vw_ref[...], axis=-1)                        # (TB, S)

    # masked_fill(mask, -inf) as an additive 0/-inf bias, lane-dense over S.
    # NOTE: a fully-masked row yields NaN (exp(-inf - -inf)), matching PyTorch
    # softmax of all -inf.
    s = s + bias_ref[...].reshape(TB, S)

    # softmax over src_len (S lives on lanes -> lane max / lane sum).
    m = jnp.max(s, axis=-1, keepdims=True)                       # (TB, 1)
    p = jnp.exp(s - m)
    denom = jnp.sum(p, axis=-1, keepdims=True)                   # (TB, 1)
    # exact reciprocal keeps the f32 reference check tight; approx=True would
    # move the divide onto the EUP slot at ~1e-4 relative error.
    normed = p * pl.reciprocal(denom)                            # (TB, S)
    sc_ref[...] = normed.reshape(TB, 1, S)       # lane-dense (S on lanes) store

    # c = normed^T @ context, accumulated over S chunks so the f32 broadcast
    # temporary is (TB, s_chunk, C) instead of a context-sized (TB, S, C) slab.
    c = jnp.zeros((TB, C), jnp.float32)
    for j in range(S // s_chunk):
        lo = j * s_chunk
        ctx_chunk = ctx_ref[:, lo:lo + s_chunk, :].astype(jnp.float32)
        w_chunk = normed[:, lo:lo + s_chunk]
        c = c + jnp.sum(w_chunk[:, :, None] * ctx_chunk, axis=1)
    c_ref[...] = c.reshape(TB, 1, C)


# ---------------------------------------------------------------------------
# Sizing helpers
# ---------------------------------------------------------------------------
def _device_kind():
    try:
        return jax.devices()[0].device_kind.lower()
    except Exception:
        return ""


def _pick_s_chunk(S, max_chunks=16):
    """Multiple-of-8 chunk that divides S with a bounded unroll count."""
    if S % 8 != 0:
        return S
    chunk = 8
    while S // chunk > max_chunks:
        chunk *= 2
        if S % chunk != 0:
            return S
    return chunk


def _pick_block_b(B, S, C, ctx_bytes, *, target_block_bytes, prefer_even_grid):
    """Largest divisor of B whose context block fits the byte budget; on 2-TC
    chips (v7x) prefer an even grid length so both TensorCores get work."""
    row_bytes = S * C * ctx_bytes
    divisors = [d for d in range(1, B + 1) if B % d == 0]
    feasible = [d for d in divisors if d * row_bytes <= target_block_bytes] or [1]
    best = max(feasible)
    if prefer_even_grid:
        even = [d for d in feasible if (B // d) % 2 == 0]
        if even:
            best = max(even)
    return best


def _vmem_bytes_estimate(block_b, S, C, Q, A, ctx_bytes, s_chunk, weight_buffers):
    """Rough VMEM footprint: double-buffered streams + weights + f32 temps."""
    lane = lambda n: -(-n // 128) * 128
    pack = 8 * max(1, 4 // ctx_bytes)                 # sublane pack of ctx dtype
    sub = lambda n, p=8: -(-n // p) * p
    f32 = 4
    ctx_blk = block_b * sub(S, pack) * lane(C) * ctx_bytes
    bias_blk = block_b * 8 * lane(S) * f32
    q_blk = block_b * sub(1, pack) * lane(Q) * ctx_bytes
    out_c = block_b * 8 * lane(C) * f32
    out_s = block_b * 8 * lane(S) * f32
    streams = 2 * (ctx_blk + bias_blk + q_blk + out_c + out_s)
    weights = weight_buffers * ((sub(C, pack) * lane(A) + sub(Q, pack) * lane(A))
                                * ctx_bytes + 2 * 8 * lane(A) * f32)
    temps = (2 * block_b * sub(S) * lane(A) * f32            # keys / e
             + block_b * sub(s_chunk) * lane(C) * f32        # chunked c temp
             + 2 * block_b * 8 * lane(C) * f32)              # c accum + store
    return streams + weights + temps


# ---------------------------------------------------------------------------
# Wrapper
# ---------------------------------------------------------------------------
def global_attention(context, context_mask, query, params, *,
                     block_b=None,
                     mxu_dtype=jnp.bfloat16,
                     target_block_bytes=2 << 20,
                     single_buffer_weights=True,
                     return_pytorch_score_layout=True):
    """Bahdanau GlobalAttention forward (project_out=False, dropout off).

    context:      (B, S, C) f32
    context_mask: (B, S, 1), nonzero == masked
    query:        (B, 1, Q) f32 or None (zeros, like the PyTorch module)
    params:       (wm, bm, wq, bq, vw, vb); nn.Linear weights pre-transposed to
                  (in, out). vb is accepted but dropped (softmax shift-invariant,
                  raw scores are never returned).

    Returns (c: (B,1,C) f32, normed_scores). Scores are (B,S,1) like PyTorch by
    default, or lane-dense (B,1,S) when return_pytorch_score_layout=False.

    mxu_dtype=jnp.bfloat16 (default) halves the dominant HBM context stream on
    every TPU generation (v5e+ MXUs take bf16 natively) while keeping f32
    accumulation / tanh / softmax; pass mxu_dtype=None for a bit-tight f32 path.
    """
    wm, bm, wq, bq, vw, vb = params
    del vb  # constant shift of every unmasked score -> softmax no-op
    B, S, C = context.shape
    A = wm.shape[1]
    Q = wq.shape[0]
    if query is None:
        query = jnp.zeros((B, 1, Q), dtype=context.dtype)

    kind = _device_kind()
    is_v7 = "v7" in kind                                   # 2 TCs, 64 MiB VMEM
    phys_vmem = (64 << 20) if is_v7 else (128 << 20)

    ctx_dtype = mxu_dtype if mxu_dtype is not None else context.dtype
    ctx_bytes = int(jnp.dtype(ctx_dtype).itemsize)
    s_chunk = _pick_s_chunk(S)

    if block_b is None:
        block_b = _pick_block_b(B, S, C, ctx_bytes,
                                target_block_bytes=target_block_bytes,
                                prefer_even_grid=is_v7)
    assert B % block_b == 0, "block_b must divide the batch size"

    # Shrink the block if the VMEM estimate does not leave headroom on this chip.
    weight_buffers = 1 if single_buffer_weights else 2
    budget = int(phys_vmem * 0.6)
    while block_b > 1 and _vmem_bytes_estimate(
            block_b, S, C, Q, A, ctx_bytes, s_chunk, weight_buffers) > budget:
        block_b = max(d for d in range(1, block_b) if B % d == 0)

    grid = (B // block_b,)
    est = _vmem_bytes_estimate(block_b, S, C, Q, A, ctx_bytes, s_chunk,
                               weight_buffers)
    vmem_limit_bytes = int(min(max(32 << 20, est * 3 // 2 + (4 << 20)),
                               phys_vmem * 3 // 4))

    # Lane-dense additive mask bias: (B, 1, S); 0 where kept, -inf where masked.
    score_bias = jnp.where(context_mask > 0.5, -jnp.inf, 0.0).astype(jnp.float32)
    score_bias = jnp.transpose(score_bias, (0, 2, 1))              # (B, 1, S)

    # Fold the two projection biases: keys + pq share a single (bm + bq) add.
    b_comb = (bm + bq).reshape(1, A).astype(jnp.float32)
    # v weight (A, 1) -> (1, A) row so the kernel can do a lane multiply.
    vw_row = vw.reshape(1, A).astype(jnp.float32)

    if mxu_dtype is not None:       # bf16 (default) operands for the MXU / HBM
        context_in = context.astype(mxu_dtype)
        query_in = query.astype(mxu_dtype)
        wm_in = wm.astype(mxu_dtype)
        wq_in = wq.astype(mxu_dtype)
    else:
        context_in, query_in, wm_in, wq_in = context, query, wm, wq

    out_shapes = (
        jax.ShapeDtypeStruct((B, 1, C), jnp.float32),   # context vector c
        jax.ShapeDtypeStruct((B, 1, S), jnp.float32),   # normed scores (lane-dense)
    )

    kernel = functools.partial(_global_attention_kernel, s_chunk=s_chunk)

    def _const_spec(shape, buffers):
        idx_map = lambda b: tuple(0 for _ in shape)
        if buffers == 1:
            try:   # constant index_map -> never re-DMAs; single buffer saves VMEM
                return pl.BlockSpec(shape, idx_map, pipeline_mode=pl.Buffered(1))
            except (TypeError, AttributeError):
                pass
        return pl.BlockSpec(shape, idx_map)

    def _run(wbuf):
        grid_spec = pltpu.PrefetchScalarGridSpec(
            num_scalar_prefetch=0,
            grid=grid,
            in_specs=[
                pl.BlockSpec((block_b, S, C), lambda b: (b, 0, 0)),   # context
                pl.BlockSpec((block_b, 1, S), lambda b: (b, 0, 0)),   # mask bias
                pl.BlockSpec((block_b, 1, Q), lambda b: (b, 0, 0)),   # query
                _const_spec((C, A), wbuf),                            # memory_layer W
                _const_spec((Q, A), wbuf),                            # query_layer W
                _const_spec((1, A), wbuf),                            # bm + bq
                _const_spec((1, A), wbuf),                            # v weight row
            ],
            out_specs=[
                pl.BlockSpec((block_b, 1, C), lambda b: (b, 0, 0)),
                pl.BlockSpec((block_b, 1, S), lambda b: (b, 0, 0)),
            ],
        )
        return pl.pallas_call(
            kernel,
            out_shape=out_shapes,
            grid_spec=grid_spec,
            compiler_params=pltpu.CompilerParams(
                dimension_semantics=("parallel",),
                vmem_limit_bytes=vmem_limit_bytes),
        )(context_in, score_bias, query_in, wm_in, wq_in, b_comb, vw_row)

    if weight_buffers == 1:
        try:
            c_out, sc_out = _run(1)
        except Exception:
            # pl.Buffered(1) not supported by this jax build -> default buffering.
            c_out, sc_out = _run(2)
    else:
        c_out, sc_out = _run(2)

    if return_pytorch_score_layout:
        sc_out = jnp.transpose(sc_out, (0, 2, 1))        # (B, S, 1) like PyTorch
    return c_out, sc_out


# ---------------------------------------------------------------------------
# Pure-JAX reference mirroring the PyTorch forward
# ---------------------------------------------------------------------------
def global_attention_ref(context, context_mask, query, params):
    wm, bm, wq, bq, vw, vb = params
    keys = context @ wm + bm                      # (B,S,A)
    pq = query @ wq + bq                          # (B,1,A)
    e = jnp.tanh(keys[:, :, None, :] + pq[:, None, :, :])   # (B,S,1,A)
    scores = (e @ vw + vb)[..., 0]                # (B,S,1)
    masked = jnp.where(context_mask > 0.5, -jnp.inf, scores)
    normed = jax.nn.softmax(masked, axis=1)       # softmax over src_len
    c = jnp.einsum('bst,bsc->btc', normed, context)
    return c, normed


if __name__ == "__main__":
    # batch, src_len, ctx_dim, query_dim, attention_dim
    B, S, C, Q, A = 4, 8, 128, 32, 64

    key = jax.random.PRNGKey(0)
    ks = jax.random.split(key, 9)

    context = jax.random.normal(ks[0], (B, S, C), dtype=jnp.float32)
    query = jax.random.normal(ks[1], (B, 1, Q), dtype=jnp.float32)
    # boolean mask -> float (1.0 == masked); guarantee not everything is masked
    mask_bool = jax.random.uniform(ks[2], (B, S, 1)) > 0.7
    mask_bool = mask_bool.at[:, 0, :].set(False)
    context_mask = mask_bool.astype(jnp.float32)

    # nn.Linear: y = x @ W^T + b, so weights are stored pre-transposed to (in, out).
    # weight_norm(v) is a reparametrization; an equivalent plain weight suffices.
    wm = 0.1 * jax.random.normal(ks[3], (C, A), dtype=jnp.float32)
    bm = 0.1 * jax.random.normal(ks[4], (1, A), dtype=jnp.float32)
    wq = 0.1 * jax.random.normal(ks[5], (Q, A), dtype=jnp.float32)
    bq = 0.1 * jax.random.normal(ks[6], (1, A), dtype=jnp.float32)
    vw = 0.1 * jax.random.normal(ks[7], (A, 1), dtype=jnp.float32)
    vb = 0.1 * jax.random.normal(ks[8], (1, 1), dtype=jnp.float32)
    params = (wm, bm, wq, bq, vw, vb)

    c_ref, sc_ref = global_attention_ref(context, context_mask, query, params)

    # Default path: bf16 context / projection weights on the MXU, f32 everywhere else.
    c_bf, sc_bf = global_attention(context, context_mask, query, params)
    c_bf, sc_bf = jax.block_until_ready((c_bf, sc_bf))
    assert jnp.allclose(c_bf, c_ref, atol=3e-2, rtol=3e-2), "bf16 context vector mismatch"
    assert jnp.allclose(sc_bf, sc_ref, atol=3e-2, rtol=3e-2), "bf16 scores mismatch"

    # f32 path: tight check against the reference.
    c_f32, sc_f32 = global_attention(context, context_mask, query, params,
                                     mxu_dtype=None)
    c_f32, sc_f32 = jax.block_until_ready((c_f32, sc_f32))
    assert jnp.allclose(c_f32, c_ref, atol=1e-4, rtol=1e-4), "f32 context vector mismatch"
    assert jnp.allclose(sc_f32, sc_ref, atol=1e-4, rtol=1e-4), "f32 scores mismatch"

    # TODO(synk): project_out / dropout / luong variants not exercised (module defaults are off).
    print("KERNEL_OK")
</pallas_src>

<mosaic_0001>
module attributes {stable_mosaic.version = 11 : i64} {
  func.func @_global_attention_kernel(%arg0: i32, %arg1: memref<4x8x128xbf16, #tpu.memory_space<vmem>>, %arg2: memref<4x1x8xf32, #tpu.memory_space<vmem>>, %arg3: memref<4x1x32xbf16, #tpu.memory_space<vmem>>, %arg4: memref<128x64xbf16, #tpu.memory_space<vmem>>, %arg5: memref<32x64xbf16, #tpu.memory_space<vmem>>, %arg6: memref<1x64xf32, #tpu.memory_space<vmem>>, %arg7: memref<1x64xf32, #tpu.memory_space<vmem>>, %arg8: memref<4x1x128xf32, #tpu.memory_space<vmem>>, %arg9: memref<4x1x8xf32, #tpu.memory_space<vmem>>) attributes {dimension_semantics = [#tpu.dimension_semantics<parallel>], iteration_bounds = array<i64: 1>, scalar_prefetch = 0 : i64, scratch_operands = 0 : i64, tpu.core_type = #tpu.core_type<tc>, window_params = [{transform_indices = @transform_0, window_bounds = array<i64: 4, 8, 128>}, {transform_indices = @transform_1, window_bounds = array<i64: 4, 1, 8>}, {transform_indices = @transform_2, window_bounds = array<i64: 4, 1, 32>}, {pipeline_mode = #tpu.pipeline_mode<synchronous>, transform_indices = @transform_3, window_bounds = array<i64: 128, 64>}, {pipeline_mode = #tpu.pipeline_mode<synchronous>, transform_indices = @transform_4, window_bounds = array<i64: 32, 64>}, {pipeline_mode = #tpu.pipeline_mode<synchronous>, transform_indices = @transform_5, window_bounds = array<i64: 1, 64>}, {pipeline_mode = #tpu.pipeline_mode<synchronous>, transform_indices = @transform_6, window_bounds = array<i64: 1, 64>}, {transform_indices = @transform_7, window_bounds = array<i64: 4, 1, 128>}, {transform_indices = @transform_8, window_bounds = array<i64: 4, 1, 8>}]} {
    %c0 = arith.constant 0 : index
    %c0_0 = arith.constant 0 : index
    %c0_1 = arith.constant 0 : index
    %0 = vector.load %arg1[%c0, %c0_0, %c0_1] : memref<4x8x128xbf16, #tpu.memory_space<vmem>>, vector<4x8x128xbf16>
    %1 = vector.shape_cast %0 : vector<4x8x128xbf16> to vector<32x128xbf16>
    %c0_2 = arith.constant 0 : index
    %c0_3 = arith.constant 0 : index
    %2 = vector.load %arg4[%c0_2, %c0_3] : memref<128x64xbf16, #tpu.memory_space<vmem>>, vector<128x64xbf16>
    %cst = arith.constant dense<0.000000e+00> : vector<32x64xf32>
    %3 = tpu.matmul %1, %2, %cst {dimension_numbers = #tpu.dot_dimension_numbers<[1], [0], [0], [1], [0, 0, 1, 1], [], []>} : vector<32x128xbf16>, vector<128x64xbf16>, vector<32x64xf32> -> vector<32x64xf32>
    %4 = vector.shape_cast %3 : vector<32x64xf32> to vector<4x8x64xf32>
    %c0_4 = arith.constant 0 : index
    %c0_5 = arith.constant 0 : index
    %c0_6 = arith.constant 0 : index
    %5 = vector.load %arg3[%c0_4, %c0_5, %c0_6] : memref<4x1x32xbf16, #tpu.memory_space<vmem>>, vector<4x1x32xbf16>
    %6 = vector.shape_cast %5 : vector<4x1x32xbf16> to vector<4x32xbf16>
    %c0_7 = arith.constant 0 : index
    %c0_8 = arith.constant 0 : index
    %7 = vector.load %arg5[%c0_7, %c0_8] : memref<32x64xbf16, #tpu.memory_space<vmem>>, vector<32x64xbf16>
    %cst_9 = arith.constant dense<0.000000e+00> : vector<4x64xf32>
    %8 = tpu.matmul %6, %7, %cst_9 {dimension_numbers = #tpu.dot_dimension_numbers<[1], [0], [0], [1], [0, 0, 1, 1], [], []>} : vector<4x32xbf16>, vector<32x64xbf16>, vector<4x64xf32> -> vector<4x64xf32>
    %c0_10 = arith.constant 0 : index
    %c0_11 = arith.constant 0 : index
    %9 = vector.load %arg6[%c0_10, %c0_11] : memref<1x64xf32, #tpu.memory_space<vmem>>, vector<1x64xf32>
    %10 = vector.broadcast %9 : vector<1x64xf32> to vector<4x64xf32>
    %11 = arith.addf %8, %10 : vector<4x64xf32>
    %12 = vector.shape_cast %11 : vector<4x64xf32> to vector<4x1x64xf32>
    %13 = vector.broadcast %12 : vector<4x1x64xf32> to vector<4x8x64xf32>
    %14 = arith.addf %4, %13 : vector<4x8x64xf32>
    %15 = math.tanh %14 : vector<4x8x64xf32>
    %c0_12 = arith.constant 0 : index
    %c0_13 = arith.constant 0 : index
    %16 = vector.load %arg7[%c0_12, %c0_13] : memref<1x64xf32, #tpu.memory_space<vmem>>, vector<1x64xf32>
    %17 = vector.shape_cast %16 : vector<1x64xf32> to vector<1x1x64xf32>
    %18 = vector.broadcast %17 : vector<1x1x64xf32> to vector<4x8x64xf32>
    %19 = arith.mulf %15, %18 : vector<4x8x64xf32>
    %cst_14 = arith.constant dense<0.000000e+00> : vector<4x8xf32>
    %20 = vector.multi_reduction <add>, %19, %cst_14 [2] : vector<4x8x64xf32> to vector<4x8xf32>
    %c0_15 = arith.constant 0 : index
    %c0_16 = arith.constant 0 : index
    %c0_17 = arith.constant 0 : index
    %21 = vector.load %arg2[%c0_15, %c0_16, %c0_17] : memref<4x1x8xf32, #tpu.memory_space<vmem>>, vector<4x1x8xf32>
    %22 = vector.shape_cast %21 : vector<4x1x8xf32> to vector<4x8xf32>
    %23 = arith.addf %20, %22 : vector<4x8xf32>
    %cst_18 = arith.constant dense<0xFF800000> : vector<4xf32>
    %24 = vector.multi_reduction <maximumf>, %23, %cst_18 [1] : vector<4x8xf32> to vector<4xf32>
    %25 = vector.shape_cast %24 : vector<4xf32> to vector<4x1xf32>
    %26 = vector.broadcast %25 : vector<4x1xf32> to vector<4x8xf32>
    %27 = arith.subf %23, %26 : vector<4x8xf32>
    %28 = math.exp %27 : vector<4x8xf32>
    %cst_19 = arith.constant dense<0.000000e+00> : vector<4xf32>
    %29 = vector.multi_reduction <add>, %28, %cst_19 [1] : vector<4x8xf32> to vector<4xf32>
    %30 = vector.shape_cast %29 : vector<4xf32> to vector<4x1xf32>
    %31 = tpu.reciprocal %30 : vector<4x1xf32> -> vector<4x1xf32>
    %32 = vector.broadcast %31 : vector<4x1xf32> to vector<4x8xf32>
    %33 = arith.mulf %28, %32 : vector<4x8xf32>
    %34 = vector.shape_cast %33 : vector<4x8xf32> to vector<4x1x8xf32>
    %c0_20 = arith.constant 0 : index
    %c0_21 = arith.constant 0 : index
    %c0_22 = arith.constant 0 : index
    %35 = vector.load %arg9[%c0_20, %c0_21, %c0_22] : memref<4x1x8xf32, #tpu.memory_space<vmem>>, vector<4x1x8xf32>
    tpu.vector_store %arg9[%c0_20, %c0_21, %c0_22], %34 {strides = array<i32>} : memref<4x1x8xf32, #tpu.memory_space<vmem>>, vector<4x1x8xf32>,
    %cst_23 = arith.constant 0.000000e+00 : f32
    %36 = vector.broadcast %cst_23 : f32 to vector<4x128xf32>
    %c0_24 = arith.constant 0 : index
    %c0_25 = arith.constant 0 : index
    %c0_26 = arith.constant 0 : index
    %37 = vector.load %arg1[%c0_24, %c0_25, %c0_26] : memref<4x8x128xbf16, #tpu.memory_space<vmem>>, vector<4x8x128xbf16>
    %38 = arith.extf %37 : vector<4x8x128xbf16> to vector<4x8x128xf32>
    %39 = vector.shape_cast %33 : vector<4x8xf32> to vector<4x8x1xf32>
    %40 = vector.broadcast %39 : vector<4x8x1xf32> to vector<4x8x128xf32>
    %41 = arith.mulf %40, %38 : vector<4x8x128xf32>
    %cst_27 = arith.constant dense<0.000000e+00> : vector<4x128xf32>
    %42 = vector.multi_reduction <add>, %41, %cst_27 [1] : vector<4x8x128xf32> to vector<4x128xf32>
    %43 = arith.addf %36, %42 : vector<4x128xf32>
    %44 = vector.shape_cast %43 : vector<4x128xf32> to vector<4x1x128xf32>
    %c0_28 = arith.constant 0 : index
    %c0_29 = arith.constant 0 : index
    %c0_30 = arith.constant 0 : index
    %45 = vector.load %arg8[%c0_28, %c0_29, %c0_30] : memref<4x1x128xf32, #tpu.memory_space<vmem>>, vector<4x1x128xf32>
    tpu.vector_store %arg8[%c0_28, %c0_29, %c0_30], %44 {strides = array<i32>} : memref<4x1x128xf32, #tpu.memory_space<vmem>>, vector<4x1x128xf32>,
    return
  }
  func.func @transform_0(%arg0: i32) -> (i32, i32, i32) {
    %c0_i32 = arith.constant 0 : i32
    %c0_i32_0 = arith.constant 0 : i32
    %c0_i32_1 = arith.constant 0 : i32
    return %arg0, %c0_i32, %c0_i32_0 : i32, i32, i32
  }
  func.func @transform_1(%arg0: i32) -> (i32, i32, i32) {
    %c0_i32 = arith.constant 0 : i32
    %c0_i32_0 = arith.constant 0 : i32
    %c0_i32_1 = arith.constant 0 : i32
    return %arg0, %c0_i32, %c0_i32_0 : i32, i32, i32
  }
  func.func @transform_2(%arg0: i32) -> (i32, i32, i32) {
    %c0_i32 = arith.constant 0 : i32
    %c0_i32_0 = arith.constant 0 : i32
    %c0_i32_1 = arith.constant 0 : i32
    return %arg0, %c0_i32, %c0_i32_0 : i32, i32, i32
  }
  func.func @transform_3(%arg0: i32) -> (i32, i32) {
    %c0_i32 = arith.constant 0 : i32
    %c0_i32_0 = arith.constant 0 : i32
    %c0_i32_1 = arith.constant 0 : i32
    return %c0_i32, %c0_i32_0 : i32, i32
  }
  func.func @transform_4(%arg0: i32) -> (i32, i32) {
    %c0_i32 = arith.constant 0 : i32
    %c0_i32_0 = arith.constant 0 : i32
    %c0_i32_1 = arith.constant 0 : i32
    return %c0_i32, %c0_i32_0 : i32, i32
  }
  func.func @transform_5(%arg0: i32) -> (i32, i32) {
    %c0_i32 = arith.constant 0 : i32
    %c0_i32_0 = arith.constant 0 : i32
    %c0_i32_1 = arith.constant 0 : i32
    return %c0_i32, %c0_i32_0 : i32, i32
  }
  func.func @transform_6(%arg0: i32) -> (i32, i32) {
    %c0_i32 = arith.constant 0 : i32
    %c0_i32_0 = arith.constant 0 : i32
    %c0_i32_1 = arith.constant 0 : i32
    return %c0_i32, %c0_i32_0 : i32, i32
  }
  func.func @transform_7(%arg0: i32) -> (i32, i32, i32) {
    %c0_i32 = arith.constant 0 : i32
    %c0_i32_0 = arith.constant 0 : i32
    %c0_i32_1 = arith.constant 0 : i32
    return %arg0, %c0_i32, %c0_i32_0 : i32, i32, i32
  }
  func.func @transform_8(%arg0: i32) -> (i32, i32, i32) {
    %c0_i32 = arith.constant 0 : i32
    %c0_i32_0 = arith.constant 0 : i32
    %c0_i32_1 = arith.constant 0 : i32
    return %arg0, %c0_i32, %c0_i32_0 : i32, i32, i32
  }
}

module attributes {stable_mosaic.version = 11 : i64} {
  func.func @_global_attention_kernel(%arg0: i32, %arg1: memref<4x8x128xbf16, #tpu.memory_space<vmem>>, %arg2: memref<4x1x8xf32, #tpu.memory_space<vmem>>, %arg3: memref<4x1x32xbf16, #tpu.memory_space<vmem>>, %arg4: memref<128x64xbf16, #tpu.memory_space<vmem>>, %arg5: memref<32x64xbf16, #tpu.memory_space<vmem>>, %arg6: memref<1x64xf32, #tpu.memory_space<vmem>>, %arg7: memref<1x64xf32, #tpu.memory_space<vmem>>, %arg8: memref<4x1x128xf32, #tpu.memory_space<vmem>>, %arg9: memref<4x1x8xf32, #tpu.memory_space<vmem>>) attributes {dimension_semantics = [#tpu.dimension_semantics<parallel>], iteration_bounds = array<i64: 1>, scalar_prefetch = 0 : i64, scratch_operands = 0 : i64, tpu.core_type = #tpu.core_type<tc>, window_params = [{transform_indices = @transform_0, window_bounds = array<i64: 4, 8, 128>}, {transform_indices = @transform_1, window_bounds = array<i64: 4, 1, 8>}, {transform_indices = @transform_2, window_bounds = array<i64: 4, 1, 32>}, {pipeline_mode = #tpu.pipeline_mode<synchronous>, transform_indices = @transform_3, window_bounds = array<i64: 128, 64>}, {pipeline_mode = #tpu.pipeline_mode<synchronous>, transform_indices = @transform_4, window_bounds = array<i64: 32, 64>}, {pipeline_mode = #tpu.pipeline_mode<synchronous>, transform_indices = @transform_5, window_bounds = array<i64: 1, 64>}, {pipeline_mode = #tpu.pipeline_mode<synchronous>, transform_indices = @transform_6, window_bounds = array<i64: 1, 64>}, {transform_indices = @transform_7, window_bounds = array<i64: 4, 1, 128>}, {transform_indices = @transform_8, window_bounds = array<i64: 4, 1, 8>}]} {
    %c0 = arith.constant 0 : index
    %c0_0 = arith.constant 0 : index
    %c0_1 = arith.constant 0 : index
    %0 = vector.load %arg1[%c0, %c0_0, %c0_1] : memref<4x8x128xbf16, #tpu.memory_space<vmem>>, vector<4x8x128xbf16>
    %1 = vector.shape_cast %0 : vector<4x8x128xbf16> to vector<32x128xbf16>
    %c0_2 = arith.constant 0 : index
    %c0_3 = arith.constant 0 : index
    %2 = vector.load %arg4[%c0_2, %c0_3] : memref<128x64xbf16, #tpu.memory_space<vmem>>, vector<128x64xbf16>
    %cst = arith.constant dense<0.000000e+00> : vector<32x64xf32>
    %3 = tpu.matmul %1, %2, %cst {dimension_numbers = #tpu.dot_dimension_numbers<[1], [0], [0], [1], [0, 0, 1, 1], [], []>} : vector<32x128xbf16>, vector<128x64xbf16>, vector<32x64xf32> -> vector<32x64xf32>
    %4 = vector.shape_cast %3 : vector<32x64xf32> to vector<4x8x64xf32>
    %c0_4 = arith.constant 0 : index
    %c0_5 = arith.constant 0 : index
    %c0_6 = arith.constant 0 : index
    %5 = vector.load %arg3[%c0_4, %c0_5, %c0_6] : memref<4x1x32xbf16, #tpu.memory_space<vmem>>, vector<4x1x32xbf16>
    %6 = vector.shape_cast %5 : vector<4x1x32xbf16> to vector<4x32xbf16>
    %c0_7 = arith.constant 0 : index
    %c0_8 = arith.constant 0 : index
    %7 = vector.load %arg5[%c0_7, %c0_8] : memref<32x64xbf16, #tpu.memory_space<vmem>>, vector<32x64xbf16>
    %cst_9 = arith.constant dense<0.000000e+00> : vector<4x64xf32>
    %8 = tpu.matmul %6, %7, %cst_9 {dimension_numbers = #tpu.dot_dimension_numbers<[1], [0], [0], [1], [0, 0, 1, 1], [], []>} : vector<4x32xbf16>, vector<32x64xbf16>, vector<4x64xf32> -> vector<4x64xf32>
    %c0_10 = arith.constant 0 : index
    %c0_11 = arith.constant 0 : index
    %9 = vector.load %arg6[%c0_10, %c0_11] : memref<1x64xf32, #tpu.memory_space<vmem>>, vector<1x64xf32>
    %10 = vector.broadcast %9 : vector<1x64xf32> to vector<4x64xf32>
    %11 = arith.addf %8, %10 : vector<4x64xf32>
    %12 = vector.shape_cast %11 : vector<4x64xf32> to vector<4x1x64xf32>
    %13 = vector.broadcast %12 : vector<4x1x64xf32> to vector<4x8x64xf32>
    %14 = arith.addf %4, %13 : vector<4x8x64xf32>
    %15 = math.tanh %14 : vector<4x8x64xf32>
    %c0_12 = arith.constant 0 : index
    %c0_13 = arith.constant 0 : index
    %16 = vector.load %arg7[%c0_12, %c0_13] : memref<1x64xf32, #tpu.memory_space<vmem>>, vector<1x64xf32>
    %17 = vector.shape_cast %16 : vector<1x64xf32> to vector<1x1x64xf32>
    %18 = vector.broadcast %17 : vector<1x1x64xf32> to vector<4x8x64xf32>
    %19 = arith.mulf %15, %18 : vector<4x8x64xf32>
    %cst_14 = arith.constant dense<0.000000e+00> : vector<4x8xf32>
    %20 = vector.multi_reduction <add>, %19, %cst_14 [2] : vector<4x8x64xf32> to vector<4x8xf32>
    %c0_15 = arith.constant 0 : index
    %c0_16 = arith.constant 0 : index
    %c0_17 = arith.constant 0 : index
    %21 = vector.load %arg2[%c0_15, %c0_16, %c0_17] : memref<4x1x8xf32, #tpu.memory_space<vmem>>, vector<4x1x8xf32>
    %22 = vector.shape_cast %21 : vector<4x1x8xf32> to vector<4x8xf32>
    %23 = arith.addf %20, %22 : vector<4x8xf32>
    %cst_18 = arith.constant dense<0xFF800000> : vector<4xf32>
    %24 = vector.multi_reduction <maximumf>, %23, %cst_18 [1] : vector<4x8xf32> to vector<4xf32>
    %25 = vector.shape_cast %24 : vector<4xf32> to vector<4x1xf32>
    %26 = vector.broadcast %25 : vector<4x1xf32> to vector<4x8xf32>
    %27 = arith.subf %23, %26 : vector<4x8xf32>
    %28 = math.exp %27 : vector<4x8xf32>
    %cst_19 = arith.constant dense<0.000000e+00> : vector<4xf32>
    %29 = vector.multi_reduction <add>, %28, %cst_19 [1] : vector<4x8xf32> to vector<4xf32>
    %30 = vector.shape_cast %29 : vector<4xf32> to vector<4x1xf32>
    %31 = tpu.reciprocal %30 : vector<4x1xf32> -> vector<4x1xf32>
    %32 = vector.broadcast %31 : vector<4x1xf32> to vector<4x8xf32>
    %33 = arith.mulf %28, %32 : vector<4x8xf32>
    %34 = vector.shape_cast %33 : vector<4x8xf32> to vector<4x1x8xf32>
    %c0_20 = arith.constant 0 : index
    %c0_21 = arith.constant 0 : index
    %c0_22 = arith.constant 0 : index
    %35 = vector.load %arg9[%c0_20, %c0_21, %c0_22] : memref<4x1x8xf32, #tpu.memory_space<vmem>>, vector<4x1x8xf32>
    tpu.vector_store %arg9[%c0_20, %c0_21, %c0_22], %34 {strides = array<i32>} : memref<4x1x8xf32, #tpu.memory_space<vmem>>, vector<4x1x8xf32>,
    %cst_23 = arith.constant 0.000000e+00 : f32
    %36 = vector.broadcast %cst_23 : f32 to vector<4x128xf32>
    %c0_24 = arith.constant 0 : index
    %c0_25 = arith.constant 0 : index
    %c0_26 = arith.constant 0 : index
    %37 = vector.load %arg1[%c0_24, %c0_25, %c0_26] : memref<4x8x128xbf16, #tpu.memory_space<vmem>>, vector<4x8x128xbf16>
    %38 = arith.extf %37 : vector<4x8x128xbf16> to vector<4x8x128xf32>
    %39 = vector.shape_cast %33 : vector<4x8xf32> to vector<4x8x1xf32>
    %40 = vector.broadcast %39 : vector<4x8x1xf32> to vector<4x8x128xf32>
    %41 = arith.mulf %40, %38 : vector<4x8x128xf32>
    %cst_27 = arith.constant dense<0.000000e+00> : vector<4x128xf32>
    %42 = vector.multi_reduction <add>, %41, %cst_27 [1] : vector<4x8x128xf32> to vector<4x128xf32>
    %43 = arith.addf %36, %42 : vector<4x128xf32>
    %44 = vector.shape_cast %43 : vector<4x128xf32> to vector<4x1x128xf32>
    %c0_28 = arith.constant 0 : index
    %c0_29 = arith.constant 0 : index
    %c0_30 = arith.constant 0 : index
    %45 = vector.load %arg8[%c0_28, %c0_29, %c0_30] : memref<4x1x128xf32, #tpu.memory_space<vmem>>, vector<4x1x128xf32>
    tpu.vector_store %arg8[%c0_28, %c0_29, %c0_30], %44 {strides = array<i32>} : memref<4x1x128xf32, #tpu.memory_space<vmem>>, vector<4x1x128xf32>,
    return
  }
  func.func @transform_0(%arg0: i32) -> (i32, i32, i32) {
    %c0_i32 = arith.constant 0 : i32
    %c0_i32_0 = arith.constant 0 : i32
    %c0_i32_1 = arith.constant 0 : i32
    return %arg0, %c0_i32, %c0_i32_0 : i32, i32, i32
  }
  func.func @transform_1(%arg0: i32) -> (i32, i32, i32) {
    %c0_i32 = arith.constant 0 : i32
    %c0_i32_0 = arith.constant 0 : i32
    %c0_i32_1 = arith.constant 0 : i32
    return %arg0, %c0_i32, %c0_i32_0 : i32, i32, i32
  }
  func.func @transform_2(%arg0: i32) -> (i32, i32, i32) {
    %c0_i32 = arith.constant 0 : i32
    %c0_i32_0 = arith.constant 0 : i32
    %c0_i32_1 = arith.constant 0 : i32
    return %arg0, %c0_i32, %c0_i32_0 : i32, i32, i32
  }
  func.func @transform_3(%arg0: i32) -> (i32, i32) {
    %c0_i32 = arith.constant 0 : i32
    %c0_i32_0 = arith.constant 0 : i32
    %c0_i32_1 = arith.constant 0 : i32
    return %c0_i32, %c0_i32_0 : i32, i32
  }
  func.func @transform_4(%arg0: i32) -> (i32, i32) {
    %c0_i32 = arith.constant 0 : i32
    %c0_i32_0 = arith.constant 0 : i32
    %c0_i32_1 = arith.constant 0 : i32
    return %c0_i32, %c0_i32_0 : i32, i32
  }
  func.func @transform_5(%arg0: i32) -> (i32, i32) {
    %c0_i32 = arith.constant 0 : i32
    %c0_i32_0 = arith.constant 0 : i32
    %c0_i32_1 = arith.constant 0 : i32
    return %c0_i32, %c0_i32_0 : i32, i32
  }
  func.func @transform_6(%arg0: i32) -> (i32, i32) {
    %c0_i32 = arith.constant 0 : i32
    %c0_i32_0 = arith.constant 0 : i32
    %c0_i32_1 = arith.constant 0 : i32
    return %c0_i32, %c0_i32_0 : i32, i32
  }
  func.func @transform_7(%arg0: i32) -> (i32, i32, i32) {
    %c0_i32 = arith.constant 0 : i32
    %c0_i32_0 = arith.constant 0 : i32
    %c0_i32_1 = arith.constant 0 : i32
    return %arg0, %c0_i32, %c0_i32_0 : i32, i32, i32
  }
  func.func @transform_8(%arg0: i32) -> (i32, i32, i32) {
    %c0_i32 = arith.constant 0 : i32
    %c0_i32_0 = arith.constant 0 : i32
    %c0_i32_1 = arith.constant 0 : i32
    return %arg0, %c0_i32, %c0_i32_0 : i32, i32, i32
  }
}

</mosaic_0001>

<bundles_post_ra>
// kernel: tpu_custom_call.1
= control target key start
LH: loop header
LB: loop body
LE: loop exit
PB: predicated region body
PF: predicated region fallthrough
CT: control target
= control target key end

     0   :  { %14 = vsyncpa [#allocation3], 0  ;;  %v848_v2 = vmov 0.0   ;;  %vm849_vm0 = vmmov 0   ;;  %v189_v5 = vlaneseq  ;;  %v850_v8 = vmov 1966171168   ;;  %s1050_s0 = inlined_call_operand.vmem [shape: bf16[4,8,128], index: 0, kind: input, shape index: {}]   ;;  %s1051_s1 = inlined_call_operand.vmem [shape: f32[4,1,8], index: 1, kind: input, shape index: {}]   ;;  %s1052_s2 = inlined_call_operand.vmem [shape: bf16[4,1,32], index: 2, kind: input, shape index: {}]   ;;  %s1053_s3 = inlined_call_operand.vmem [shape: bf16[128,64], index: 3, kind: input, shape index: {}]   ;;  %s1054_s4 = inlined_call_operand.vmem [shape: bf16[32,64], index: 4, kind: input, shape index: {}]   ;;  %s1055_s5 = inlined_call_operand.vmem [shape: f32[1,64], index: 5, kind: input, shape index: {}]   ;;  %s1056_s6 = inlined_call_operand.vmem [shape: f32[1,64], index: 6, kind: input, shape index: {}]   ;;  %s1057_s7 = inlined_call_operand.hbm [shape: f32[4,1,128], index: 7, kind: output, shape index: {0}]   ;;  %s1058_s8 = inlined_call_operand.hbm [shape: f32[4,1,8], index: 8, kind: output, shape index: {1}]  }
   0x1   :  { %v770_v0 = vld [vmem:[%s1053_s3] sm:$0xff]   ;;  %v771_v1 = vld [vmem:[%s1053_s3 + $0x8] sm:$0xff]   ;;  %752 = vmatprep.subr.bf16.mxu1 %v848_v2  ;;  %756 = vmatprep.mubr.msk.bf16.mxu1 %vm849_vm0, %v848_v2  ;;  %v772_v3 = vld [vmem:[%s1053_s3 + $0x10] sm:$0xff]   ;;  %v187_v9 = vunpack.c.l.s4 %v850_v8 }
   0x2   :  { %732 = vmatprep.subr.bf16.mxu0 %v770_v0  ;;  %v774_v4 = vld [vmem:[%s1054_s4] sm:$0xff]   ;;  %v776_v6 = vld [vmem:[%s1054_s4 + $0x8] sm:$0xff]   ;;  %v773_v7 = vld [vmem:[%s1053_s3 + $0x18] sm:$0xff]   ;;  %v920_v10 = vshrl.u32 %v189_v5, 7 }
   0x3   :  { %733 = vmatpush3.bf16.msra.mxu0 %v770_v0  ;;  %753 = vmatpush3.bf16.msra.mxu1 %v774_v4  ;;  %v698_v11 = vld.sshfl [vmem:[%s1052_s2] sm:$0x1 pattern:$0x75316420]  ;;  %v188_v15 = vunpack.c.0.s8 %v187_v9 }
   0x4   :  { %734 = vmatprep.subr.bf16.mxu0 %v771_v1  ;;  %754 = vmatprep.subr.bf16.mxu1 %v848_v2  ;;  %v699_v12 = vld.sshfl [vmem:[%s1052_s2 + $0x1] sm:$0x1 pattern:$0x75316420] }
   0x5   :  { %v700_v13 = vld.sshfl [vmem:[%s1052_s2 + $0x2] sm:$0x1 pattern:$0x75316420]  ;;  %v191_v17 = vsub.s32 %v188_v15, %v920_v10 }
   0x6   :  { %v701_v14 = vld.sshfl [vmem:[%s1052_s2 + $0x3] sm:$0x1 pattern:$0x75316420] }
   0x7   :  { %735 = vmatpush3.bf16.msra.mxu0 %v771_v1  ;;  %755 = vmatpush3.bf16.msra.mxu1 %v776_v6  ;;  %v775_v16 = vld [vmem:[%s1053_s3 + $0x20] sm:$0xff]   ;;  %v192_v19 = vrot.slane %v698_v11, %v191_v17  ;;  %v206_v20 = vrot.slane %v699_v12, %v191_v17  ;;  %v220_v21 = vrot.slane %v700_v13, %v191_v17 }
   0x8   :  { %736 = vmatprep.subr.bf16.mxu0 %v772_v3  ;;  %v780_v18 = vld [vmem:[%s1050_s0] sm:$0xff]   ;;  %v234_v22 = vrot.slane %v701_v14, %v191_v17 }
   0x9   :  { %748 = vmatprep.mubr.bf16.mxu0 %v780_v18 }
   0xb   :  { %737 = vmatpush3.bf16.msra.mxu0 %v772_v3 }
   0xc   :  { %738 = vmatprep.subr.bf16.mxu0 %v773_v7 }
   0xf   :  { %739 = vmatpush3.bf16.msra.mxu0 %v773_v7 }
  0x10   :  { %15 = vsyncpa [#allocation5], 0  ;;  %740 = vmatprep.subr.bf16.mxu0 %v775_v16  ;;  %v235_v23 = vunpack.c.l.b16 %v192_v19  ;;  %v236_v24 = vunpack.c.l.b16 %v206_v20  ;;  %v237_v25 = vunpack.c.l.b16 %v220_v21  ;;  %v238_v26 = vunpack.c.l.b16 %v234_v22  ;;  %v777_v27 = vld [vmem:[%s1053_s3 + $0x28] sm:$0xff]   ;;  %v778_v32 = vld [vmem:[%s1053_s3 + $0x30] sm:$0xff]  }
  0x11   :  { %vm240_vm1 = vcmask 1041409   ;;  %vm243_vm2 = vcmask 1042434   ;;  %vm246_vm3 = vcmask 1043459   ;;  %vm261_vm4 = vcmask 261120   ;;  %v779_v36 = vld [vmem:[%s1053_s3 + $0x38] sm:$0xff]   ;;  %v781_v37 = vld [vmem:[%s1050_s0 + $0x8] sm:$0xff]  }
  0x12   :  { %v239_v28 = vrot.slane %v236_v24, 7  ;;  %v242_v29 = vrot.slane %v237_v25, 6  ;;  %v245_v30 = vrot.slane %v238_v26, 5  ;;  %v697_v38 = vld [vmem:[%s1055_s5] ss:$0 sm:$0xff]  ;;  %v960_v47 = vsub.s32 0, %v920_v10 }
  0x13   :  { %741 = vmatpush3.bf16.msra.mxu0 %v775_v16  ;;  %v705_v63 = vld [vmem:[%s1056_s6] ss:$0 sm:$0xff]  ;;  %vm369_vm5 = vcmask 523264   ;;  %v707_v14 = vld [vmem:[%s1051_s1 + $0x1] ss:$0 sm:$0xff]  ;;  %vm464_vm6 = vcmask 60416  }
  0x14   :  { %v241_v31 = vsel %vm240_vm1, %v239_v28, %v235_v23  ;;  %742 = vmatprep.subr.bf16.mxu0 %v777_v27  ;;  %v708_v15 = vld [vmem:[%s1051_s1 + $0x2] ss:$0 sm:$0xff]  ;;  %v706_v16 = vld [vmem:[%s1051_s1] ss:$0 sm:$0xff]  ;;  %v709_v18 = vld [vmem:[%s1051_s1 + $0x3] ss:$0 sm:$0xff] }
  0x15   :  { %v244_v33 = vsel %vm243_vm2, %v242_v29, %v241_v31  ;;  %v443_v31 = vand.u32 127, %v189_v5  ;;  %vm602_vm7 = vcmask 57344  }
  0x16   :  { %v247_v34 = vsel %vm246_vm3, %v245_v30, %v244_v33 }
  0x17   :  { %v248_v35 = vpack.c.b16 %v247_v34, %v247_v34  ;;  %743 = vmatpush3.bf16.msra.mxu0 %v777_v27  ;;  %v983_v33 = vsub.s32 %v443_v31, %v920_v10 }
  0x18   :  { %744 = vmatprep.subr.bf16.mxu0 %v778_v32 }
  0x19   :  { %757 = vmatmul.mubr.msk.bf16.vlgmr.msra.gmra.mrb[0].mxu1 %vm261_vm4, %v248_v35 }
  0x1b   :  { %745 = vmatpush3.bf16.msra.mxu0 %v778_v32 }
  0x1c   :  { %746 = vmatprep.subr.bf16.mxu0 %v779_v36 }
  0x1f   :  { %747 = vmatpush3.bf16.msra.mxu0 %v779_v36 }
  0x22   :  { %749 = vmatmul.mubr.bf16.vlgmr.msra.gmra.mrb[0].mxu0 %v781_v37 }
  0xec   :  { %v299_v39 = vpop.f32.mrb[0].mxu1 }
  0xed   :  { %v300_v40 = vadd.f32 %v697_v38, %v299_v39  ;;  %v758_v41 = vpop.f32.mrb[1].mxu1 }
  0xee   :  { %v302_v42 = vpop.f32.mrb[2].mxu1 }
  0xef   :  { %v312_v43 = vrot.slane %v300_v40, %v191_v17  ;;  %v759_v44 = vpop.f32.mrb[3].mxu1 }
  0xf0   :  { %v475_v44 = vsub.s32 1, %v920_v10 }
  0xf1   :  { %v313_v45 = vcombine.high %v312_v43, %v312_v43  ;;  %v320_v46 = vrot.slane %v312_v43, %v191_v17 }
  0xf3   :  { %v328_v48 = vcombine.high %v320_v46, %v320_v46  ;;  %v327_v49 = vrot.slane %v313_v45, %v191_v17  ;;  %v333_v52 = vrot.slane %v320_v46, %v960_v47  ;;  %v851_v17 = vmov 0  }
  0xf4   :  { %769 = vset.pattern.permute.xlu1 %v851_v17  ;;  %768 = vset.pattern.permute.xlu0 %v851_v17  ;;  %v479_v45 = vsub.s32 2, %v920_v10 }
  0xf5   :  { %v750_v50 = vpop.f32.mrb[0].mxu0  ;;  %v341_v51 = vrot.slane %v328_v48, %v960_v47  ;;  %v329_v53 = vcombine.high %v327_v49, %v327_v49  ;;  %v337_v59 = vrot.slane %v327_v49, %v960_v47 }
  0xf6   :  { %v145_v54 = vpop.f32.mrb[1].mxu0 }
  0xf7   :  { %v352_v55 = vadd.f32 %v750_v50, %v341_v51  ;;  %v350_v56 = vadd.f32 %v333_v52, %v145_v54  ;;  %v751_v57 = vpop.f32.mrb[2].mxu0  ;;  %v345_v58 = vrot.slane %v329_v53, %v960_v47  ;;  %v483_v50 = vsub.s32 3, %v920_v10 }
  0xf8   :  { %v148_v60 = vpop.f32.mrb[3].mxu0 }
  0xf9   :  { %782 = vtanh.f32 %v352_v55  ;;  %v353_v61 = vadd.f32 %v751_v57, %v345_v58  ;;  %v351_v62 = vadd.f32 %v337_v59, %v148_v60 }
  0xfa   :  { %784 = vtanh.f32 %v350_v56 }
  0xfb   :  { %786 = vtanh.f32 %v353_v61 }
  0xfc   :  { %788 = vtanh.f32 %v351_v62 }
 0x103   :  { %v783_v0 = vpop.eup %782 }
 0x104   :  { %v785_v1 = vpop.eup %784  ;;  %v367_v2 = vmul.f32 %v783_v0, %v705_v63 }
 0x105   :  { %v787_v3 = vpop.eup %786  ;;  %v365_v4 = vmul.f32 %v785_v1, %v705_v63 }
 0x106   :  { %v789_v6 = vpop.eup %788  ;;  %v376_v7 = vsel %vm369_vm5, %v367_v2, 0.0  ;;  %v368_v8 = vmul.f32 %v787_v3, %v705_v63 }
 0x107   :  { %377 = vadd.xlane.f32.xlu1 %v376_v7  ;;  %v370_v9 = vsel %vm369_vm5, %v365_v4, 0.0  ;;  %v366_v11 = vmul.f32 %v789_v6, %v705_v63 }
 0x108   :  { %371 = vadd.xlane.f32.xlu0 %v370_v9  ;;  %v379_v12 = vsel %vm369_vm5, %v368_v8, 0.0 }
 0x109   :  { %v373_v13 = vsel %vm369_vm5, %v366_v11, 0.0 }
 0x10b   :  { %380 = vadd.xlane.f32.xlu1 %v379_v12 }
 0x10c   :  { %374 = vadd.xlane.f32.xlu0 %v373_v13 }
 0x11c   :  { %410 = vbcast.lane.b32.xlu1 %v707_v14, 256 }
 0x120   :  { %413 = vbcast.lane.b32.xlu1 %v708_v15, 256 }
 0x122   :  { %407 = vbcast.lane.b32.xlu0 %v706_v16, 256 }
 0x124   :  { %416 = vbcast.lane.b32.xlu1 %v709_v18, 256 }
 0x194   :  { %v378_v19 = vpop.xlane.xlu1 %377 }
 0x195   :  { %v372_v20 = vpop.xlane.xlu0 %371 }
 0x198   :  { %v381_v21 = vpop.xlane.xlu1 %380 }
 0x199   :  { %v375_v22 = vpop.xlane.xlu0 %374 }
 0x19c   :  { %v411_v23 = vpop.permute.xlu1 %410 }
 0x19d   :  { %v423_v24 = vadd.f32 %v411_v23, %v375_v22  ;;  %v408_v25 = vpop.permute.xlu0 %407 }
 0x19e   :  { %v422_v26 = vadd.f32 %v408_v25, %v372_v20 }
 0x19f   :  { %434 = vperm.xlu1 %769, %v423_v24  }
 0x1a0   :  { %v414_v27 = vpop.permute.xlu1 %413  ;;  %431 = vperm.xlu0 %768, %v422_v26  }
 0x1a1   :  { %v424_v28 = vadd.f32 %v414_v27, %v378_v19 }
 0x1a3   :  { %437 = vperm.xlu1 %769, %v424_v28  }
 0x1a4   :  { %v417_v29 = vpop.permute.xlu1 %416 }
 0x1a5   :  { %v425_v30 = vadd.f32 %v417_v29, %v381_v21 }
 0x1a7   :  { %440 = vperm.xlu0 %768, %v425_v30  }
 0x21e   :  { %v435_v32 = vpop.permute.xlu1 %434 }
 0x21f   :  { %v432_v34 = vpop.permute.xlu0 %431  ;;  %v451_v36 = vrot.slane %v435_v32, %v983_v33 }
 0x220   :  { %v447_v37 = vrot.slane %v432_v34, %v983_v33 }
 0x222   :  { %v438_v35 = vpop.permute.xlu1 %437  ;;  %v460_v40 = vsel %vm240_vm1, %v451_v36, %v447_v37 }
 0x223   :  { %v455_v38 = vrot.slane %v438_v35, %v983_v33 }
 0x225   :  { %v461_v5 = vsel %vm243_vm2, %v455_v38, %v460_v40 }
 0x226   :  { %v441_v39 = vpop.permute.xlu0 %440 }
 0x227   :  { %v459_v41 = vrot.slane %v441_v39, %v983_v33 }
 0x229   :  { %v462_v42 = vsel %vm246_vm3, %v459_v41, %v461_v5 }
 0x22a   :  { %v465_v43 = vsel %vm464_vm6, %v462_v42, -inf }
 0x22b   :  { %466 = vmax.xlane.f32.xlu1 %v465_v43 }
 0x2b8   :  { %v467_v46 = vpop.xlane.xlu1 %466 }
 0x2b9   :  { %v472_v48 = vrot.slane %v467_v46, %v960_v47  ;;  %v476_v49 = vrot.slane %v467_v46, %v475_v44  ;;  %v480_v51 = vrot.slane %v467_v46, %v479_v45  ;;  %v484_v55 = vrot.slane %v467_v46, %v483_v50 }
 0x2bb   :  { %v489_v52 = vsub.f32 %v422_v26, %v472_v48  ;;  %v490_v53 = vsub.f32 %v423_v24, %v476_v49  ;;  %v491_v56 = vsub.f32 %v424_v28, %v480_v51  ;;  %v492_v58 = vsub.f32 %v425_v30, %v484_v55  ;;  %v711_v24 = vld [vmem:[%s1050_s0] sm:$0xff]  }
 0x2bc   :  { %v713_v25 = vunpack.c.h.bf16 %v711_v24  ;;  %v712_v26 = vunpack.c.l.bf16 %v711_v24 }
 0x2bd   :  { %v493_v54 = vmul.f32 1.442695, %v489_v52  ;;  %v495_v57 = vmul.f32 1.442695, %v490_v53  ;;  %v497_v59 = vmul.f32 1.442695, %v491_v56 }
 0x2be   :  { %v499_v60 = vmul.f32 1.442695, %v492_v58 }
 0x2bf   :  { %790 = vpow2.f32 %v493_v54 }
 0x2c0   :  { %792 = vpow2.f32 %v495_v57 }
 0x2c1   :  { %794 = vpow2.f32 %v497_v59 }
 0x2c2   :  { %796 = vpow2.f32 %v499_v60 }
 0x2c9   :  { %v791_v61 = vpop.eup %790 }
 0x2ca   :  { %506 = vperm.xlu0 %768, %v791_v61   ;;  %v793_v62 = vpop.eup %792 }
 0x2cb   :  { %v795_v63 = vpop.eup %794 }
 0x2cc   :  { %v797_v10 = vpop.eup %796 }
 0x2ce   :  { %509 = vperm.xlu0 %768, %v793_v62  }
 0x2d2   :  { %512 = vperm.xlu0 %768, %v795_v63  }
 0x2d6   :  { %515 = vperm.xlu0 %768, %v797_v10  }
 0x349   :  { %v507_v0 = vpop.permute.xlu0 %506 }
 0x34a   :  { %v520_v6 = vrot.slane %v507_v0, %v983_v33 }
 0x34d   :  { %v510_v1 = vpop.permute.xlu0 %509 }
 0x34e   :  { %v524_v3 = vrot.slane %v510_v1, %v983_v33 }
 0x350   :  { %v533_v8 = vsel %vm240_vm1, %v524_v3, %v520_v6 }
 0x351   :  { %v513_v2 = vpop.permute.xlu0 %512 }
 0x352   :  { %v528_v4 = vrot.slane %v513_v2, %v983_v33 }
 0x354   :  { %v534_v11 = vsel %vm243_vm2, %v528_v4, %v533_v8 }
 0x355   :  { %v516_v7 = vpop.permute.xlu0 %515 }
 0x356   :  { %v532_v9 = vrot.slane %v516_v7, %v983_v33 }
 0x358   :  { %v535_v12 = vsel %vm246_vm3, %v532_v9, %v534_v11 }
 0x359   :  { %v537_v13 = vsel %vm464_vm6, %v535_v12, 0.0 }
 0x35a   :  { %538 = vadd.xlane.f32.xlu0 %v537_v13 }
 0x3e7   :  { %v539_v14 = vpop.xlane.xlu0 %538 }
 0x3e8   :  { %798 = vrcp.f32 %v539_v14 }
 0x3f2   :  { %v799_v15 = vpop.eup %798 }
 0x3f3   :  { %v549_v16 = vrot.slane %v799_v15, %v475_v44  ;;  %v545_v17 = vrot.slane %v799_v15, %v960_v47  ;;  %v553_v20 = vrot.slane %v799_v15, %v479_v45  ;;  %v557_v22 = vrot.slane %v799_v15, %v483_v50  ;;  %v718_v47 = vld [vmem:[%s1050_s0 + $0x8] sm:$0xff]   ;;  %s852_s0 = smov [#allocation4]  }
 0x3f4   :  { %v716_v29 = vunpack.c.l.bf16 %v718_v47  ;;  %v717_v5 = vunpack.c.h.bf16 %v718_v47  ;;  %s672_s24 = sshll.u32 %s852_s0, 4  ;;  %s673_s24 = int_to_ptr.vmem [resolvable:$true] %s672_s24 }
 0x3f5   :  { %v563_v18 = vmul.f32 %v793_v62, %v549_v16  ;;  %v562_v19 = vmul.f32 %v791_v61, %v545_v17  ;;  %v564_v21 = vmul.f32 %v795_v63, %v553_v20  ;;  %v565_v23 = vmul.f32 %v797_v10, %v557_v22  ;;  %s800_s25 = scalar_lea.vmem %s673_s24, 64  ;;  %p805_p1 = scmp.lt.s32.totalorder %s673_s24, %s673_s24 }
 0x3f6   :  { %p801_p0 = scmp.ne.s32.totalorder %s673_s24, %s800_s25  ;;  %p806_p2 = scmp.lt.s32.totalorder %s800_s25, %s800_s25 }
 0x3f7   :  { %574 = vperm.xlu0 %768, %v563_v18   ;;  %571 = vperm.xlu1 %769, %v562_v19  }
 0x3f8   :  { %p807_p3 = por %p806_p2, %p805_p1 }
 0x3fa   :  { %p808_p4 = pnand %p807_p3, %p801_p0 }
 0x3fb   :  { %577 = vperm.xlu1 %769, %v564_v21  }
 0x3ff   :  { %580 = vperm.xlu1 %769, %v565_v23  }
 0x476   :  { %v575_v27 = vpop.permute.xlu0 %574  ;;  %v572_v28 = vpop.permute.xlu1 %571 }
 0x477   :  { %v589_v30 = vrot.slane %v575_v27, %v983_v33  ;;  %v620_v31 = vmul.f32 %v713_v25, %v575_v27  ;;  %v585_v32 = vrot.slane %v572_v28, %v983_v33  ;;  %v619_v34 = vmul.f32 %v712_v26, %v572_v28 }
 0x479   :  { %604 = vst.msk [vmem:[#allocation4 + $0x1] sm:$0x1] %vm602_vm7, %v589_v30  ;;  %v629_v35 = vrot.slane %v620_v31, 4  ;;  %603 = vst.msk [vmem:[#allocation4] sm:$0x1] %vm602_vm7, %v585_v32  ;;  %v623_v36 = vrot.slane %v619_v34, 4 }
 0x47a   :  { %v578_v37 = vpop.permute.xlu1 %577 }
 0x47b   :  { %v630_v38 = vadd.f32 %v629_v35, %v620_v31  ;;  %v624_v39 = vadd.f32 %v623_v36, %v619_v34  ;;  %v593_v40 = vrot.slane %v578_v37, %v983_v33  ;;  %v621_v41 = vmul.f32 %v716_v29, %v578_v37 }
 0x47d   :  { %v631_v42 = vrot.slane %v630_v38, 2  ;;  %v625_v43 = vrot.slane %v624_v39, 2  ;;  %605 = vst.msk [vmem:[#allocation4 + $0x2] sm:$0x1] %vm602_vm7, %v593_v40  ;;  %v635_v44 = vrot.slane %v621_v41, 4 }
 0x47e   :  { %v581_v45 = vpop.permute.xlu1 %580 }
 0x47f   :  { %v632_v46 = vadd.f32 %v631_v42, %v630_v38  ;;  %v626_v48 = vadd.f32 %v625_v43, %v624_v39  ;;  %v636_v49 = vadd.f32 %v635_v44, %v621_v41  ;;  %v597_v50 = vrot.slane %v581_v45, %v983_v33 }
 0x480   :  { %v622_v51 = vmul.f32 %v717_v5, %v581_v45 }
 0x481   :  { %v633_v52 = vrot.slane %v632_v46, 1  ;;  %v627_v53 = vrot.slane %v626_v48, 1  ;;  %v637_v54 = vrot.slane %v636_v49, 2  ;;  %606 = vst.msk [vmem:[#allocation4 + $0x3] sm:$0x1] %vm602_vm7, %v597_v50 }
 0x482   :  { %v641_v55 = vrot.slane %v622_v51, 4 }
 0x483   :  { %811 = shalt.err (!%p808_p4)
}
 0x484   :  { %s812_s2 = scalar_lea.hbm %s1058_s8, 64 }
 0x485   :  { %p813_p5 = scmp.ne.s32.totalorder %s1058_s8, %s812_s2  ;;  %p816_p6 = scmp.lt.u32.totalorder %s812_s2, %s1058_s8 }
 0x487   :  { %p818_p7 = pnand %p816_p6, %p813_p5 }
 0x489   :  { %821 = shalt.err (!%p818_p7)
}
 0x48a   :  { %s853_s10 = smov 16   ;;  %s854_s11 = smov 1   ;;  %v634_v33 = vadd.f32 %v633_v52, %v632_v46  ;;  %v628_v56 = vadd.f32 %v627_v53, %v626_v48  ;;  %v638_v57 = vadd.f32 %v637_v54, %v636_v49  ;;  %v642_v58 = vadd.f32 %v641_v55, %v622_v51 }
 0x48b   :  { %678 = dma.vmem_to_hbm [thread:$0]  %s673_s24, 64, %s1058_s8, [#allocation5], %s853_s10, %s853_s10, %s854_s11  }
 0x48c   :  { %652 = vst [vmem:[#allocation2 + $0x1] sm:$0x1] %v634_v33  ;;  %651 = vst [vmem:[#allocation2] sm:$0x1] %v628_v56  ;;  %v639_v59 = vrot.slane %v638_v57, 1  ;;  %v643_v60 = vrot.slane %v642_v58, 2 }
 0x48d   :  { %s855_s14 = smov [#allocation2]  }
 0x48e   :  { %v640_v61 = vadd.f32 %v639_v59, %v638_v57  ;;  %v644_v62 = vadd.f32 %v643_v60, %v642_v58  ;;  %s660_s3 = sshll.u32 %s855_s14, 4  ;;  %s661_s3 = int_to_ptr.vmem [resolvable:$true] %s660_s3 }
 0x48f   :  { %s822_s5 = scalar_lea.vmem %s661_s3, 64  ;;  %p827_p9 = scmp.lt.s32.totalorder %s661_s3, %s661_s3 }
 0x490   :  { %653 = vst [vmem:[#allocation2 + $0x2] sm:$0x1] %v640_v61  ;;  %v645_v63 = vrot.slane %v644_v62, 1  ;;  %p823_p8 = scmp.ne.s32.totalorder %s661_s3, %s822_s5  ;;  %p828_p10 = scmp.lt.s32.totalorder %s822_s5, %s822_s5 }
 0x492   :  { %v646_v10 = vadd.f32 %v645_v63, %v644_v62  ;;  %p829_p11 = por %p828_p10, %p827_p9 }
 0x494   :  { %654 = vst [vmem:[#allocation2 + $0x3] sm:$0x1] %v646_v10  ;;  %p830_p12 = pnand %p829_p11, %p823_p8 }
 0x496   :  { %833 = shalt.err (!%p830_p12)
}
 0x497   :  { %s834_s16 = scalar_lea.hbm %s1057_s7, 64 }
 0x498   :  { %p835_p13 = scmp.ne.s32.totalorder %s1057_s7, %s834_s16  ;;  %p838_p0 = scmp.lt.u32.totalorder %s834_s16, %s1057_s7 }
 0x49a   :  { %p840_p1 = pnand %p838_p0, %p835_p13 }
 0x49c   :  { %843 = shalt.err (!%p840_p1)
}
 0x49d   :  { %666 = dma.vmem_to_hbm [thread:$0]  %s661_s3, 64, %s1057_s7, [#allocation3], %s853_s10, %s853_s10, %s854_s11  }
 0x49e   :  { %844 = dma.done.wait [#allocation3], 64  }
 0x49f   :  { %845 = vsyncadd [#allocation3], 4294967232 }
 0x4a0   :  { %846 = dma.done.wait [#allocation5], 64  }
 0x4a1   :  { %847 = vsyncadd [#allocation5], 4294967232 }
 0x4a2   :  { %685 = vsyncpa [#allocation3], 1 }
 0x4a3   :  { %686 = vsyncpa [#allocation5], 1 }

// kernel: tpu_custom_call.1
= control target key start
LH: loop header
LB: loop body
LE: loop exit
PB: predicated region body
PF: predicated region fallthrough
CT: control target
= control target key end

     0   :  { %14 = vsyncpa [#allocation3], 0  ;;  %v848_v2 = vmov 0.0   ;;  %vm849_vm0 = vmmov 0   ;;  %v189_v5 = vlaneseq  ;;  %v850_v8 = vmov 1966171168   ;;  %s1050_s0 = inlined_call_operand.vmem [shape: bf16[4,8,128], index: 0, kind: input, shape index: {}]   ;;  %s1051_s1 = inlined_call_operand.vmem [shape: f32[4,1,8], index: 1, kind: input, shape index: {}]   ;;  %s1052_s2 = inlined_call_operand.vmem [shape: bf16[4,1,32], index: 2, kind: input, shape index: {}]   ;;  %s1053_s3 = inlined_call_operand.vmem [shape: bf16[128,64], index: 3, kind: input, shape index: {}]   ;;  %s1054_s4 = inlined_call_operand.vmem [shape: bf16[32,64], index: 4, kind: input, shape index: {}]   ;;  %s1055_s5 = inlined_call_operand.vmem [shape: f32[1,64], index: 5, kind: input, shape index: {}]   ;;  %s1056_s6 = inlined_call_operand.vmem [shape: f32[1,64], index: 6, kind: input, shape index: {}]   ;;  %s1057_s7 = inlined_call_operand.hbm [shape: f32[4,1,128], index: 7, kind: output, shape index: {0}]   ;;  %s1058_s8 = inlined_call_operand.hbm [shape: f32[4,1,8], index: 8, kind: output, shape index: {1}]  }
   0x1   :  { %v770_v0 = vld [vmem:[%s1053_s3] sm:$0xff]   ;;  %v771_v1 = vld [vmem:[%s1053_s3 + $0x8] sm:$0xff]   ;;  %752 = vmatprep.subr.bf16.mxu1 %v848_v2  ;;  %756 = vmatprep.mubr.msk.bf16.mxu1 %vm849_vm0, %v848_v2  ;;  %v772_v3 = vld [vmem:[%s1053_s3 + $0x10] sm:$0xff]   ;;  %v187_v9 = vunpack.c.l.s4 %v850_v8 }
   0x2   :  { %732 = vmatprep.subr.bf16.mxu0 %v770_v0  ;;  %v774_v4 = vld [vmem:[%s1054_s4] sm:$0xff]   ;;  %v776_v6 = vld [vmem:[%s1054_s4 + $0x8] sm:$0xff]   ;;  %v773_v7 = vld [vmem:[%s1053_s3 + $0x18] sm:$0xff]   ;;  %v920_v10 = vshrl.u32 %v189_v5, 7 }
   0x3   :  { %733 = vmatpush3.bf16.msra.mxu0 %v770_v0  ;;  %753 = vmatpush3.bf16.msra.mxu1 %v774_v4  ;;  %v698_v11 = vld.sshfl [vmem:[%s1052_s2] sm:$0x1 pattern:$0x75316420]  ;;  %v188_v15 = vunpack.c.0.s8 %v187_v9 }
   0x4   :  { %734 = vmatprep.subr.bf16.mxu0 %v771_v1  ;;  %754 = vmatprep.subr.bf16.mxu1 %v848_v2  ;;  %v699_v12 = vld.sshfl [vmem:[%s1052_s2 + $0x1] sm:$0x1 pattern:$0x75316420] }
   0x5   :  { %v700_v13 = vld.sshfl [vmem:[%s1052_s2 + $0x2] sm:$0x1 pattern:$0x75316420]  ;;  %v191_v17 = vsub.s32 %v188_v15, %v920_v10 }
   0x6   :  { %v701_v14 = vld.sshfl [vmem:[%s1052_s2 + $0x3] sm:$0x1 pattern:$0x75316420] }
   0x7   :  { %735 = vmatpush3.bf16.msra.mxu0 %v771_v1  ;;  %755 = vmatpush3.bf16.msra.mxu1 %v776_v6  ;;  %v775_v16 = vld [vmem:[%s1053_s3 + $0x20] sm:$0xff]   ;;  %v192_v19 = vrot.slane %v698_v11, %v191_v17  ;;  %v206_v20 = vrot.slane %v699_v12, %v191_v17  ;;  %v220_v21 = vrot.slane %v700_v13, %v191_v17 }
   0x8   :  { %736 = vmatprep.subr.bf16.mxu0 %v772_v3  ;;  %v780_v18 = vld [vmem:[%s1050_s0] sm:$0xff]   ;;  %v234_v22 = vrot.slane %v701_v14, %v191_v17 }
   0x9   :  { %748 = vmatprep.mubr.bf16.mxu0 %v780_v18 }
   0xb   :  { %737 = vmatpush3.bf16.msra.mxu0 %v772_v3 }
   0xc   :  { %738 = vmatprep.subr.bf16.mxu0 %v773_v7 }
   0xf   :  { %739 = vmatpush3.bf16.msra.mxu0 %v773_v7 }
  0x10   :  { %15 = vsyncpa [#allocation5], 0  ;;  %740 = vmatprep.subr.bf16.mxu0 %v775_v16  ;;  %v235_v23 = vunpack.c.l.b16 %v192_v19  ;;  %v236_v24 = vunpack.c.l.b16 %v206_v20  ;;  %v237_v25 = vunpack.c.l.b16 %v220_v21  ;;  %v238_v26 = vunpack.c.l.b16 %v234_v22  ;;  %v777_v27 = vld [vmem:[%s1053_s3 + $0x28] sm:$0xff]   ;;  %v778_v32 = vld [vmem:[%s1053_s3 + $0x30] sm:$0xff]  }
  0x11   :  { %vm240_vm1 = vcmask 1041409   ;;  %vm243_vm2 = vcmask 1042434   ;;  %vm246_vm3 = vcmask 1043459   ;;  %vm261_vm4 = vcmask 261120   ;;  %v779_v36 = vld [vmem:[%s1053_s3 + $0x38] sm:$0xff]   ;;  %v781_v37 = vld [vmem:[%s1050_s0 + $0x8] sm:$0xff]  }
  0x12   :  { %v239_v28 = vrot.slane %v236_v24, 7  ;;  %v242_v29 = vrot.slane %v237_v25, 6  ;;  %v245_v30 = vrot.slane %v238_v26, 5  ;;  %v697_v38 = vld [vmem:[%s1055_s5] ss:$0 sm:$0xff]  ;;  %v960_v47 = vsub.s32 0, %v920_v10 }
  0x13   :  { %741 = vmatpush3.bf16.msra.mxu0 %v775_v16  ;;  %v705_v63 = vld [vmem:[%s1056_s6] ss:$0 sm:$0xff]  ;;  %vm369_vm5 = vcmask 523264   ;;  %v707_v14 = vld [vmem:[%s1051_s1 + $0x1] ss:$0 sm:$0xff]  ;;  %vm464_vm6 = vcmask 60416  }
  0x14   :  { %v241_v31 = vsel %vm240_vm1, %v239_v28, %v235_v23  ;;  %742 = vmatprep.subr.bf16.mxu0 %v777_v27  ;;  %v708_v15 = vld [vmem:[%s1051_s1 + $0x2] ss:$0 sm:$0xff]  ;;  %v706_v16 = vld [vmem:[%s1051_s1] ss:$0 sm:$0xff]  ;;  %v709_v18 = vld [vmem:[%s1051_s1 + $0x3] ss:$0 sm:$0xff] }
  0x15   :  { %v244_v33 = vsel %vm243_vm2, %v242_v29, %v241_v31  ;;  %v443_v31 = vand.u32 127, %v189_v5  ;;  %vm602_vm7 = vcmask 57344  }
  0x16   :  { %v247_v34 = vsel %vm246_vm3, %v245_v30, %v244_v33 }
  0x17   :  { %v248_v35 = vpack.c.b16 %v247_v34, %v247_v34  ;;  %743 = vmatpush3.bf16.msra.mxu0 %v777_v27  ;;  %v983_v33 = vsub.s32 %v443_v31, %v920_v10 }
  0x18   :  { %744 = vmatprep.subr.bf16.mxu0 %v778_v32 }
  0x19   :  { %757 = vmatmul.mubr.msk.bf16.vlgmr.msra.gmra.mrb[0].mxu1 %vm261_vm4, %v248_v35 }
  0x1b   :  { %745 = vmatpush3.bf16.msra.mxu0 %v778_v32 }
  0x1c   :  { %746 = vmatprep.subr.bf16.mxu0 %v779_v36 }
  0x1f   :  { %747 = vmatpush3.bf16.msra.mxu0 %v779_v36 }
  0x22   :  { %749 = vmatmul.mubr.bf16.vlgmr.msra.gmra.mrb[0].mxu0 %v781_v37 }
  0xec   :  { %v299_v39 = vpop.f32.mrb[0].mxu1 }
  0xed   :  { %v300_v40 = vadd.f32 %v697_v38, %v299_v39  ;;  %v758_v41 = vpop.f32.mrb[1].mxu1 }
  0xee   :  { %v302_v42 = vpop.f32.mrb[2].mxu1 }
  0xef   :  { %v312_v43 = vrot.slane %v300_v40, %v191_v17  ;;  %v759_v44 = vpop.f32.mrb[3].mxu1 }
  0xf0   :  { %v475_v44 = vsub.s32 1, %v920_v10 }
  0xf1   :  { %v313_v45 = vcombine.high %v312_v43, %v312_v43  ;;  %v320_v46 = vrot.slane %v312_v43, %v191_v17 }
  0xf3   :  { %v328_v48 = vcombine.high %v320_v46, %v320_v46  ;;  %v327_v49 = vrot.slane %v313_v45, %v191_v17  ;;  %v333_v52 = vrot.slane %v320_v46, %v960_v47  ;;  %v851_v17 = vmov 0  }
  0xf4   :  { %769 = vset.pattern.permute.xlu1 %v851_v17  ;;  %768 = vset.pattern.permute.xlu0 %v851_v17  ;;  %v479_v45 = vsub.s32 2, %v920_v10 }
  0xf5   :  { %v750_v50 = vpop.f32.mrb[0].mxu0  ;;  %v341_v51 = vrot.slane %v328_v48, %v960_v47  ;;  %v329_v53 = vcombine.high %v327_v49, %v327_v49  ;;  %v337_v59 = vrot.slane %v327_v49, %v960_v47 }
  0xf6   :  { %v145_v54 = vpop.f32.mrb[1].mxu0 }
  0xf7   :  { %v352_v55 = vadd.f32 %v750_v50, %v341_v51  ;;  %v350_v56 = vadd.f32 %v333_v52, %v145_v54  ;;  %v751_v57 = vpop.f32.mrb[2].mxu0  ;;  %v345_v58 = vrot.slane %v329_v53, %v960_v47  ;;  %v483_v50 = vsub.s32 3, %v920_v10 }
  0xf8   :  { %v148_v60 = vpop.f32.mrb[3].mxu0 }
  0xf9   :  { %782 = vtanh.f32 %v352_v55  ;;  %v353_v61 = vadd.f32 %v751_v57, %v345_v58  ;;  %v351_v62 = vadd.f32 %v337_v59, %v148_v60 }
  0xfa   :  { %784 = vtanh.f32 %v350_v56 }
  0xfb   :  { %786 = vtanh.f32 %v353_v61 }
  0xfc   :  { %788 = vtanh.f32 %v351_v62 }
 0x103   :  { %v783_v0 = vpop.eup %782 }
 0x104   :  { %v785_v1 = vpop.eup %784  ;;  %v367_v2 = vmul.f32 %v783_v0, %v705_v63 }
 0x105   :  { %v787_v3 = vpop.eup %786  ;;  %v365_v4 = vmul.f32 %v785_v1, %v705_v63 }
 0x106   :  { %v789_v6 = vpop.eup %788  ;;  %v376_v7 = vsel %vm369_vm5, %v367_v2, 0.0  ;;  %v368_v8 = vmul.f32 %v787_v3, %v705_v63 }
 0x107   :  { %377 = vadd.xlane.f32.xlu1 %v376_v7  ;;  %v370_v9 = vsel %vm369_vm5, %v365_v4, 0.0  ;;  %v366_v11 = vmul.f32 %v789_v6, %v705_v63 }
 0x108   :  { %371 = vadd.xlane.f32.xlu0 %v370_v9  ;;  %v379_v12 = vsel %vm369_vm5, %v368_v8, 0.0 }
 0x109   :  { %v373_v13 = vsel %vm369_vm5, %v366_v11, 0.0 }
 0x10b   :  { %380 = vadd.xlane.f32.xlu1 %v379_v12 }
 0x10c   :  { %374 = vadd.xlane.f32.xlu0 %v373_v13 }
 0x11c   :  { %410 = vbcast.lane.b32.xlu1 %v707_v14, 256 }
 0x120   :  { %413 = vbcast.lane.b32.xlu1 %v708_v15, 256 }
 0x122   :  { %407 = vbcast.lane.b32.xlu0 %v706_v16, 256 }
 0x124   :  { %416 = vbcast.lane.b32.xlu1 %v709_v18, 256 }
 0x194   :  { %v378_v19 = vpop.xlane.xlu1 %377 }
 0x195   :  { %v372_v20 = vpop.xlane.xlu0 %371 }
 0x198   :  { %v381_v21 = vpop.xlane.xlu1 %380 }
 0x199   :  { %v375_v22 = vpop.xlane.xlu0 %374 }
 0x19c   :  { %v411_v23 = vpop.permute.xlu1 %410 }
 0x19d   :  { %v423_v24 = vadd.f32 %v411_v23, %v375_v22  ;;  %v408_v25 = vpop.permute.xlu0 %407 }
 0x19e   :  { %v422_v26 = vadd.f32 %v408_v25, %v372_v20 }
 0x19f   :  { %434 = vperm.xlu1 %769, %v423_v24  }
 0x1a0   :  { %v414_v27 = vpop.permute.xlu1 %413  ;;  %431 = vperm.xlu0 %768, %v422_v26  }
 0x1a1   :  { %v424_v28 = vadd.f32 %v414_v27, %v378_v19 }
 0x1a3   :  { %437 = vperm.xlu1 %769, %v424_v28  }
 0x1a4   :  { %v417_v29 = vpop.permute.xlu1 %416 }
 0x1a5   :  { %v425_v30 = vadd.f32 %v417_v29, %v381_v21 }
 0x1a7   :  { %440 = vperm.xlu0 %768, %v425_v30  }
 0x21e   :  { %v435_v32 = vpop.permute.xlu1 %434 }
 0x21f   :  { %v432_v34 = vpop.permute.xlu0 %431  ;;  %v451_v36 = vrot.slane %v435_v32, %v983_v33 }
 0x220   :  { %v447_v37 = vrot.slane %v432_v34, %v983_v33 }
 0x222   :  { %v438_v35 = vpop.permute.xlu1 %437  ;;  %v460_v40 = vsel %vm240_vm1, %v451_v36, %v447_v37 }
 0x223   :  { %v455_v38 = vrot.slane %v438_v35, %v983_v33 }
 0x225   :  { %v461_v5 = vsel %vm243_vm2, %v455_v38, %v460_v40 }
 0x226   :  { %v441_v39 = vpop.permute.xlu0 %440 }
 0x227   :  { %v459_v41 = vrot.slane %v441_v39, %v983_v33 }
 0x229   :  { %v462_v42 = vsel %vm246_vm3, %v459_v41, %v461_v5 }
 0x22a   :  { %v465_v43 = vsel %vm464_vm6, %v462_v42, -inf }
 0x22b   :  { %466 = vmax.xlane.f32.xlu1 %v465_v43 }
 0x2b8   :  { %v467_v46 = vpop.xlane.xlu1 %466 }
 0x2b9   :  { %v472_v48 = vrot.slane %v467_v46, %v960_v47  ;;  %v476_v49 = vrot.slane %v467_v46, %v475_v44  ;;  %v480_v51 = vrot.slane %v467_v46, %v479_v45  ;;  %v484_v55 = vrot.slane %v467_v46, %v483_v50 }
 0x2bb   :  { %v489_v52 = vsub.f32 %v422_v26, %v472_v48  ;;  %v490_v53 = vsub.f32 %v423_v24, %v476_v49  ;;  %v491_v56 = vsub.f32 %v424_v28, %v480_v51  ;;  %v492_v58 = vsub.f32 %v425_v30, %v484_v55  ;;  %v711_v24 = vld [vmem:[%s1050_s0] sm:$0xff]  }
 0x2bc   :  { %v713_v25 = vunpack.c.h.bf16 %v711_v24  ;;  %v712_v26 = vunpack.c.l.bf16 %v711_v24 }
 0x2bd   :  { %v493_v54 = vmul.f32 1.442695, %v489_v52  ;;  %v495_v57 = vmul.f32 1.442695, %v490_v53  ;;  %v497_v59 = vmul.f32 1.442695, %v491_v56 }
 0x2be   :  { %v499_v60 = vmul.f32 1.442695, %v492_v58 }
 0x2bf   :  { %790 = vpow2.f32 %v493_v54 }
 0x2c0   :  { %792 = vpow2.f32 %v495_v57 }
 0x2c1   :  { %794 = vpow2.f32 %v497_v59 }
 0x2c2   :  { %796 = vpow2.f32 %v499_v60 }
 0x2c9   :  { %v791_v61 = vpop.eup %790 }
 0x2ca   :  { %506 = vperm.xlu0 %768, %v791_v61   ;;  %v793_v62 = vpop.eup %792 }
 0x2cb   :  { %v795_v63 = vpop.eup %794 }
 0x2cc   :  { %v797_v10 = vpop.eup %796 }
 0x2ce   :  { %509 = vperm.xlu0 %768, %v793_v62  }
 0x2d2   :  { %512 = vperm.xlu0 %768, %v795_v63  }
 0x2d6   :  { %515 = vperm.xlu0 %768, %v797_v10  }
 0x349   :  { %v507_v0 = vpop.permute.xlu0 %506 }
 0x34a   :  { %v520_v6 = vrot.slane %v507_v0, %v983_v33 }
 0x34d   :  { %v510_v1 = vpop.permute.xlu0 %509 }
 0x34e   :  { %v524_v3 = vrot.slane %v510_v1, %v983_v33 }
 0x350   :  { %v533_v8 = vsel %vm240_vm1, %v524_v3, %v520_v6 }
 0x351   :  { %v513_v2 = vpop.permute.xlu0 %512 }
 0x352   :  { %v528_v4 = vrot.slane %v513_v2, %v983_v33 }
 0x354   :  { %v534_v11 = vsel %vm243_vm2, %v528_v4, %v533_v8 }
 0x355   :  { %v516_v7 = vpop.permute.xlu0 %515 }
 0x356   :  { %v532_v9 = vrot.slane %v516_v7, %v983_v33 }
 0x358   :  { %v535_v12 = vsel %vm246_vm3, %v532_v9, %v534_v11 }
 0x359   :  { %v537_v13 = vsel %vm464_vm6, %v535_v12, 0.0 }
 0x35a   :  { %538 = vadd.xlane.f32.xlu0 %v537_v13 }
 0x3e7   :  { %v539_v14 = vpop.xlane.xlu0 %538 }
 0x3e8   :  { %798 = vrcp.f32 %v539_v14 }
 0x3f2   :  { %v799_v15 = vpop.eup %798 }
 0x3f3   :  { %v549_v16 = vrot.slane %v799_v15, %v475_v44  ;;  %v545_v17 = vrot.slane %v799_v15, %v960_v47  ;;  %v553_v20 = vrot.slane %v799_v15, %v479_v45  ;;  %v557_v22 = vrot.slane %v799_v15, %v483_v50  ;;  %v718_v47 = vld [vmem:[%s1050_s0 + $0x8] sm:$0xff]   ;;  %s852_s0 = smov [#allocation4]  }
 0x3f4   :  { %v716_v29 = vunpack.c.l.bf16 %v718_v47  ;;  %v717_v5 = vunpack.c.h.bf16 %v718_v47  ;;  %s672_s24 = sshll.u32 %s852_s0, 4  ;;  %s673_s24 = int_to_ptr.vmem [resolvable:$true] %s672_s24 }
 0x3f5   :  { %v563_v18 = vmul.f32 %v793_v62, %v549_v16  ;;  %v562_v19 = vmul.f32 %v791_v61, %v545_v17  ;;  %v564_v21 = vmul.f32 %v795_v63, %v553_v20  ;;  %v565_v23 = vmul.f32 %v797_v10, %v557_v22  ;;  %s800_s25 = scalar_lea.vmem %s673_s24, 64  ;;  %p805_p1 = scmp.lt.s32.totalorder %s673_s24, %s673_s24 }
 0x3f6   :  { %p801_p0 = scmp.ne.s32.totalorder %s673_s24, %s800_s25  ;;  %p806_p2 = scmp.lt.s32.totalorder %s800_s25, %s800_s25 }
 0x3f7   :  { %574 = vperm.xlu0 %768, %v563_v18   ;;  %571 = vperm.xlu1 %769, %v562_v19  }
 0x3f8   :  { %p807_p3 = por %p806_p2, %p805_p1 }
 0x3fa   :  { %p808_p4 = pnand %p807_p3, %p801_p0 }
 0x3fb   :  { %577 = vperm.xlu1 %769, %v564_v21  }
 0x3ff   :  { %580 = vperm.xlu1 %769, %v565_v23  }
 0x476   :  { %v575_v27 = vpop.permute.xlu0 %574  ;;  %v572_v28 = vpop.permute.xlu1 %571 }
 0x477   :  { %v589_v30 = vrot.slane %v575_v27, %v983_v33  ;;  %v620_v31 = vmul.f32 %v713_v25, %v575_v27  ;;  %v585_v32 = vrot.slane %v572_v28, %v983_v33  ;;  %v619_v34 = vmul.f32 %v712_v26, %v572_v28 }
 0x479   :  { %604 = vst.msk [vmem:[#allocation4 + $0x1] sm:$0x1] %vm602_vm7, %v589_v30  ;;  %v629_v35 = vrot.slane %v620_v31, 4  ;;  %603 = vst.msk [vmem:[#allocation4] sm:$0x1] %vm602_vm7, %v585_v32  ;;  %v623_v36 = vrot.slane %v619_v34, 4 }
 0x47a   :  { %v578_v37 = vpop.permute.xlu1 %577 }
 0x47b   :  { %v630_v38 = vadd.f32 %v629_v35, %v620_v31  ;;  %v624_v39 = vadd.f32 %v623_v36, %v619_v34  ;;  %v593_v40 = vrot.slane %v578_v37, %v983_v33  ;;  %v621_v41 = vmul.f32 %v716_v29, %v578_v37 }
 0x47d   :  { %v631_v42 = vrot.slane %v630_v38, 2  ;;  %v625_v43 = vrot.slane %v624_v39, 2  ;;  %605 = vst.msk [vmem:[#allocation4 + $0x2] sm:$0x1] %vm602_vm7, %v593_v40  ;;  %v635_v44 = vrot.slane %v621_v41, 4 }
 0x47e   :  { %v581_v45 = vpop.permute.xlu1 %580 }
 0x47f   :  { %v632_v46 = vadd.f32 %v631_v42, %v630_v38  ;;  %v626_v48 = vadd.f32 %v625_v43, %v624_v39  ;;  %v636_v49 = vadd.f32 %v635_v44, %v621_v41  ;;  %v597_v50 = vrot.slane %v581_v45, %v983_v33 }
 0x480   :  { %v622_v51 = vmul.f32 %v717_v5, %v581_v45 }
 0x481   :  { %v633_v52 = vrot.slane %v632_v46, 1  ;;  %v627_v53 = vrot.slane %v626_v48, 1  ;;  %v637_v54 = vrot.slane %v636_v49, 2  ;;  %606 = vst.msk [vmem:[#allocation4 + $0x3] sm:$0x1] %vm602_vm7, %v597_v50 }
 0x482   :  { %v641_v55 = vrot.slane %v622_v51, 4 }
 0x483   :  { %811 = shalt.err (!%p808_p4)
}
 0x484   :  { %s812_s2 = scalar_lea.hbm %s1058_s8, 64 }
 0x485   :  { %p813_p5 = scmp.ne.s32.totalorder %s1058_s8, %s812_s2  ;;  %p816_p6 = scmp.lt.u32.totalorder %s812_s2, %s1058_s8 }
 0x487   :  { %p818_p7 = pnand %p816_p6, %p813_p5 }
 0x489   :  { %821 = shalt.err (!%p818_p7)
}
 0x48a   :  { %s853_s10 = smov 16   ;;  %s854_s11 = smov 1   ;;  %v634_v33 = vadd.f32 %v633_v52, %v632_v46  ;;  %v628_v56 = vadd.f32 %v627_v53, %v626_v48  ;;  %v638_v57 = vadd.f32 %v637_v54, %v636_v49  ;;  %v642_v58 = vadd.f32 %v641_v55, %v622_v51 }
 0x48b   :  { %678 = dma.vmem_to_hbm [thread:$0]  %s673_s24, 64, %s1058_s8, [#allocation5], %s853_s10, %s853_s10, %s854_s11  }
 0x48c   :  { %652 = vst [vmem:[#allocation2 + $0x1] sm:$0x1] %v634_v33  ;;  %651 = vst [vmem:[#allocation2] sm:$0x1] %v628_v56  ;;  %v639_v59 = vrot.slane %v638_v57, 1  ;;  %v643_v60 = vrot.slane %v642_v58, 2 }
 0x48d   :  { %s855_s14 = smov [#allocation2]  }
 0x48e   :  { %v640_v61 = vadd.f32 %v639_v59, %v638_v57  ;;  %v644_v62 = vadd.f32 %v643_v60, %v642_v58  ;;  %s660_s3 = sshll.u32 %s855_s14, 4  ;;  %s661_s3 = int_to_ptr.vmem [resolvable:$true] %s660_s3 }
 0x48f   :  { %s822_s5 = scalar_lea.vmem %s661_s3, 64  ;;  %p827_p9 = scmp.lt.s32.totalorder %s661_s3, %s661_s3 }
 0x490   :  { %653 = vst [vmem:[#allocation2 + $0x2] sm:$0x1] %v640_v61  ;;  %v645_v63 = vrot.slane %v644_v62, 1  ;;  %p823_p8 = scmp.ne.s32.totalorder %s661_s3, %s822_s5  ;;  %p828_p10 = scmp.lt.s32.totalorder %s822_s5, %s822_s5 }
 0x492   :  { %v646_v10 = vadd.f32 %v645_v63, %v644_v62  ;;  %p829_p11 = por %p828_p10, %p827_p9 }
 0x494   :  { %654 = vst [vmem:[#allocation2 + $0x3] sm:$0x1] %v646_v10  ;;  %p830_p12 = pnand %p829_p11, %p823_p8 }
 0x496   :  { %833 = shalt.err (!%p830_p12)
}
 0x497   :  { %s834_s16 = scalar_lea.hbm %s1057_s7, 64 }
 0x498   :  { %p835_p13 = scmp.ne.s32.totalorder %s1057_s7, %s834_s16  ;;  %p838_p0 = scmp.lt.u32.totalorder %s834_s16, %s1057_s7 }
 0x49a   :  { %p840_p1 = pnand %p838_p0, %p835_p13 }
 0x49c   :  { %843 = shalt.err (!%p840_p1)
}
 0x49d   :  { %666 = dma.vmem_to_hbm [thread:$0]  %s661_s3, 64, %s1057_s7, [#allocation3], %s853_s10, %s853_s10, %s854_s11  }
 0x49e   :  { %844 = dma.done.wait [#allocation3], 64  }
 0x49f   :  { %845 = vsyncadd [#allocation3], 4294967232 }
 0x4a0   :  { %846 = dma.done.wait [#allocation5], 64  }
 0x4a1   :  { %847 = vsyncadd [#allocation5], 4294967232 }
 0x4a2   :  { %685 = vsyncpa [#allocation3], 1 }
 0x4a3   :  { %686 = vsyncpa [#allocation5], 1 }

</bundles_post_ra>
